<compile_context>
chip_gen: v6e
topology: v6e:2x2x1
jax: 0.10.0
libtpu: 0.0.40
codegen_flags: <defaults>
</compile_context>

<pallas_src>
import functools

import jax
import jax.numpy as jnp
from jax.experimental import pallas as pl
from jax.experimental.pallas import tpu as pltpu

_LANE_CHUNK = 256   # lane strip-mine width inside a batch tile (multiple of 128)


def _round_up(n, m):
    return ((n + m - 1) // m) * m


def _vmem_limit_bytes(TB, H, D_in, d_out, num_hidden, chunk=_LANE_CHUNK):
    """Generation-aware VMEM budget: enough for this kernel, capped by hardware."""
    f32 = 4
    need = 2 * (D_in + 1) * TB * f32                       # double-buffered x^T tile
    need += 2 * d_out * TB * f32                           # double-buffered out^T tile
    need += 2 * (3 * H * (D_in + 1) + num_hidden * H * (H + 1) + d_out * (H + 1)) * f32
    need += 8 * H * chunk * f32                            # z/e1/e2/d/h/t chunk temporaries
    need = 2 * need                                        # margin for compiler temporaries
    need = max(need, 32 * 1024 * 1024)                     # never below default scoped limit
    try:
        phys = int(pltpu.get_tpu_info().vmem_capacity_bytes)   # 64 MiB v7x, 128 MiB v5e/v6e
    except Exception:
        phys = 64 * 1024 * 1024                            # conservative fallback (v7x per-TC)
    return int(min(need, (3 * phys) // 4))


# ----------------------------------------------------------------------------- #
# Kernel
# ----------------------------------------------------------------------------- #
def _mmlp_kernel(hidden, num_hidden, n_chunks, chunk,
                 x_ref, wf_ref, wh_ref, bh_ref, wl_ref, bl_ref, out_ref):
    """Transposed (batch-on-lanes) modified-MLP forward for one batch tile.

    x_ref  : (D_in+1, TB)  -- x^T tile with a trailing constant-ones row (bias fold)
    wf_ref : (3H, D_in+1)  -- [enc_w1|b1 ; enc_w2|b2 ; W0|b0] fused first stage
    wh_ref : (L-2, H, H), bh_ref (L-2, H, 1) -- hidden weights already transposed
    wl_ref : (d_out, H),  bl_ref (d_out, 1)
    out_ref: (d_out, TB)   -- out^T tile
    """
    H = hidden
    wf = wf_ref[...]
    wh = wh_ref[...]
    bh = bh_ref[...]
    wl = wl_ref[...]
    bl = bl_ref[...]

    # Strip-mine the lane axis so per-chunk activations stay register-resident
    # across the whole hidden-layer chain (no (H, TB) VMEM round-trips per layer).
    @pl.loop(0, n_chunks)
    def _(c):
        start = pl.multiple_of(c * chunk, chunk)
        xc = x_ref[:, pl.ds(start, chunk)]                         # (D_in+1, chunk)

        # Fused encoders + first linear layer; biases come from the ones row.
        z = jnp.dot(wf, xc, preferred_element_type=jnp.float32)    # (3H, chunk)
        e1 = jnp.tanh(z[0:H, :])
        e2 = jnp.tanh(z[H:2 * H, :])
        h = z[2 * H:3 * H, :]
        d = e1 - e2                                                 # hoisted gate delta

        # Hidden layers:  t = tanh(W^T @ h + b);  h = e2 + t * (e1 - e2)
        for l in range(num_hidden):
            t = jnp.tanh(
                jnp.dot(wh[l], h, preferred_element_type=jnp.float32) + bh[l])
            h = e2 + t * d

        # Last linear layer (transposed): out^T = W_last @ h + b_last
        out = jnp.dot(wl, h, preferred_element_type=jnp.float32) + bl
        out_ref[:, pl.ds(start, chunk)] = out.astype(out_ref.dtype)


# ----------------------------------------------------------------------------- #
# Wrapper
# ----------------------------------------------------------------------------- #
def mmlp_forward(x, enc_w1, enc_b1, enc_w2, enc_b2, weights, biases, *,
                 block_batch=4096, x_is_transposed=False):
    """weights[l] has PyTorch shape (layers[l+1], layers[l]); biases[l] is (layers[l+1],).

    x is (B, D_in) by default; pass x_is_transposed=True to supply (D_in, B)
    directly (avoids the wrapper-side transpose for large training sets).
    """
    num_layers = len(weights)
    assert num_layers >= 3, "mMLP kernel expects at least first/one-hidden/last layers"
    assert block_batch % _LANE_CHUNK == 0

    f32 = jnp.float32
    if x_is_transposed:
        D_in, B = x.shape
        xT0 = x.astype(f32)
    else:
        B, D_in = x.shape
        xT0 = x.astype(f32).T

    H = weights[0].shape[0]
    d_out = weights[-1].shape[0]
    num_hidden = num_layers - 2

    # --- Parameter packing / orientation (done once, outside the hot loop) ----
    # Fused first stage [enc_w1; enc_w2; W0] with the biases folded in as an
    # extra column matched by a constant-ones row appended to x^T.
    w_first = jnp.concatenate([enc_w1, enc_w2, weights[0]], axis=0).astype(f32)   # (3H, D_in)
    b_first = jnp.concatenate(
        [enc_b1.reshape(-1), enc_b2.reshape(-1), biases[0].reshape(-1)],
        axis=0).reshape(-1, 1).astype(f32)                                         # (3H, 1)
    w_first = jnp.concatenate([w_first, b_first], axis=1)                          # (3H, D_in+1)

    # Hidden layers use W (no transpose) in PyTorch; transposed layout needs W.T.
    w_hidden = jnp.stack(
        [weights[l].T for l in range(1, num_layers - 1)], axis=0).astype(f32)      # (L-2, H, H)
    b_hidden = jnp.stack(
        [biases[l].reshape(-1, 1) for l in range(1, num_layers - 1)],
        axis=0).astype(f32)                                                         # (L-2, H, 1)

    w_last = weights[-1].astype(f32)                                                # (d_out, H)
    b_last = biases[-1].reshape(-1, 1).astype(f32)                                  # (d_out, 1)

    # --- Batch tiling: batch on lanes.  Large tiles amortize per-grid-step
    # overhead; keep >= 2 tiles so the "parallel" axis can shard across both
    # v7x TensorCores.
    TB = min(block_batch, _round_up(max((B + 1) // 2, 1), _LANE_CHUNK))
    B_pad = _round_up(B, TB)
    n_chunks = TB // _LANE_CHUNK

    # x^T with a bias row of ones; pad only the ragged tail (single pass, no
    # full zero-buffer re-materialization).
    xT = jnp.concatenate([xT0, jnp.ones((1, B), f32)], axis=0)                      # (D_in+1, B)
    if B_pad != B:
        xT = jnp.pad(xT, ((0, 0), (0, B_pad - B)))

    grid = (B_pad // TB,)
    kernel = functools.partial(_mmlp_kernel, H, num_hidden, n_chunks, _LANE_CHUNK)

    const2 = lambda i: (0, 0)
    const3 = lambda i: (0, 0, 0)

    flops = 2 * B_pad * (3 * H * (D_in + 1) + num_hidden * H * H + d_out * H)
    transcendentals = B_pad * (2 + num_hidden) * H
    bytes_accessed = 4 * (B_pad * (D_in + 1 + d_out)
                          + 3 * H * (D_in + 1)
                          + num_hidden * H * (H + 1)
                          + d_out * (H + 1))

    outT = pl.pallas_call(
        kernel,
        out_shape=jax.ShapeDtypeStruct((d_out, B_pad), f32),
        grid=grid,
        in_specs=[
            pl.BlockSpec((D_in + 1, TB), lambda i: (0, i)),        # x^T tile (pipelined)
            pl.BlockSpec((3 * H, D_in + 1), const2),               # fused first weights+bias
            pl.BlockSpec((num_hidden, H, H), const3),              # packed hidden weights
            pl.BlockSpec((num_hidden, H, 1), const3),              # packed hidden biases
            pl.BlockSpec((d_out, H), const2),                      # last weights
            pl.BlockSpec((d_out, 1), const2),                      # last bias
        ],
        out_specs=pl.BlockSpec((d_out, TB), lambda i: (0, i)),
        compiler_params=pltpu.CompilerParams(
            dimension_semantics=("parallel",),                     # shard batch tiles across TCs
            vmem_limit_bytes=_vmem_limit_bytes(TB, H, D_in, d_out, num_hidden),
        ),
        cost_estimate=pl.CostEstimate(
            flops=int(flops),
            transcendentals=int(transcendentals),
            bytes_accessed=int(bytes_accessed),
        ),
    )(xT, w_first, w_hidden, b_hidden, w_last, b_last)

    # Un-pad and return in the original (B, d_out) orientation.
    return outT[:, :B].T


# ----------------------------------------------------------------------------- #
# Deterministic parameter init (xavier_normal like PyTorch)
# ----------------------------------------------------------------------------- #
def xavier_normal(key, shape):
    fan_out, fan_in = shape
    std = (2.0 / (fan_in + fan_out)) ** 0.5
    return std * jax.random.normal(key, shape, dtype=jnp.float32)


def init_mmlp_params(key, layers):
    num_layers = len(layers) - 1
    keys = jax.random.split(key, num_layers + 4)
    weights, biases = [], []
    for l in range(num_layers):
        weights.append(xavier_normal(keys[l], (layers[l + 1], layers[l])))
        biases.append(jnp.zeros((layers[l + 1],), jnp.float32))
    enc_w1 = xavier_normal(keys[num_layers + 0], (layers[1], layers[0]))
    enc_b1 = xavier_normal(keys[num_layers + 1], (1, layers[1])).reshape(-1)
    enc_w2 = xavier_normal(keys[num_layers + 2], (layers[1], layers[0]))
    enc_b2 = xavier_normal(keys[num_layers + 3], (1, layers[1])).reshape(-1)
    return enc_w1, enc_b1, enc_w2, enc_b2, weights, biases


# ----------------------------------------------------------------------------- #
# Pure-JAX reference (mirrors the PyTorch forward exactly)
# ----------------------------------------------------------------------------- #
def mmlp_reference(x, enc_w1, enc_b1, enc_w2, enc_b2, weights, biases):
    e1 = jnp.tanh(x @ enc_w1.T + enc_b1)
    e2 = jnp.tanh(x @ enc_w2.T + enc_b2)
    h = x @ weights[0].T + biases[0]
    for l in range(1, len(weights) - 1):
        t = jnp.tanh(h @ weights[l] + biases[l])   # note: W, not W.T (as in source)
        h = t * e1 + (1.0 - t) * e2
    return h @ weights[-1].T + biases[-1]


# ----------------------------------------------------------------------------- #
if __name__ == "__main__":
    # layers = [D_in, H, H, H, D_out]
    layers = [4, 32, 32, 32, 2]
    batch = 300           # non-multiple of the tile -> exercises padding + 2 grid steps

    key = jax.random.PRNGKey(0)
    k_x, k_p = jax.random.split(key)

    x = jax.random.normal(k_x, (batch, layers[0]), dtype=jnp.float32)
    enc_w1, enc_b1, enc_w2, enc_b2, weights, biases = init_mmlp_params(k_p, layers)

    out = mmlp_forward(x, enc_w1, enc_b1, enc_w2, enc_b2, weights, biases)
    out = jax.block_until_ready(out)

    ref = mmlp_reference(x, enc_w1, enc_b1, enc_w2, enc_b2, weights, biases)
    assert out.shape == (batch, layers[-1])
    assert jnp.allclose(out, ref, atol=1e-5, rtol=1e-5), "mismatch vs pure-JAX reference"

    print("KERNEL_OK")
</pallas_src>

<mosaic_0001>
module attributes {stable_mosaic.version = 11 : i64} {
  func.func @_mmlp_kernel(%arg0: i32, %arg1: memref<5x256xf32, #tpu.memory_space<vmem>>, %arg2: memref<96x5xf32, #tpu.memory_space<vmem>>, %arg3: memref<2x32x32xf32, #tpu.memory_space<vmem>>, %arg4: memref<2x32x1xf32, #tpu.memory_space<vmem>>, %arg5: memref<2x32xf32, #tpu.memory_space<vmem>>, %arg6: memref<2x1xf32, #tpu.memory_space<vmem>>, %arg7: memref<2x256xf32, #tpu.memory_space<vmem>>) attributes {dimension_semantics = [#tpu.dimension_semantics<parallel>], iteration_bounds = array<i64: 2>, scalar_prefetch = 0 : i64, scratch_operands = 0 : i64, tpu.core_type = #tpu.core_type<tc>, window_params = [{transform_indices = @transform_0, window_bounds = array<i64: 5, 256>}, {pipeline_mode = #tpu.pipeline_mode<synchronous>, transform_indices = @transform_1, window_bounds = array<i64: 96, 5>}, {pipeline_mode = #tpu.pipeline_mode<synchronous>, transform_indices = @transform_2, window_bounds = array<i64: 2, 32, 32>}, {pipeline_mode = #tpu.pipeline_mode<synchronous>, transform_indices = @transform_3, window_bounds = array<i64: 2, 32, 1>}, {pipeline_mode = #tpu.pipeline_mode<synchronous>, transform_indices = @transform_4, window_bounds = array<i64: 2, 32>}, {pipeline_mode = #tpu.pipeline_mode<synchronous>, transform_indices = @transform_5, window_bounds = array<i64: 2, 1>}, {transform_indices = @transform_6, window_bounds = array<i64: 2, 256>}]} {
    %c0 = arith.constant 0 : index
    %c0_0 = arith.constant 0 : index
    %0 = vector.load %arg2[%c0, %c0_0] : memref<96x5xf32, #tpu.memory_space<vmem>>, vector<96x5xf32>
    %c0_1 = arith.constant 0 : index
    %c0_2 = arith.constant 0 : index
    %c0_3 = arith.constant 0 : index
    %1 = vector.load %arg3[%c0_1, %c0_2, %c0_3] : memref<2x32x32xf32, #tpu.memory_space<vmem>>, vector<2x32x32xf32>
    %c0_4 = arith.constant 0 : index
    %c0_5 = arith.constant 0 : index
    %c0_6 = arith.constant 0 : index
    %2 = vector.load %arg4[%c0_4, %c0_5, %c0_6] : memref<2x32x1xf32, #tpu.memory_space<vmem>>, vector<2x32x1xf32>
    %c0_7 = arith.constant 0 : index
    %c0_8 = arith.constant 0 : index
    %3 = vector.load %arg5[%c0_7, %c0_8] : memref<2x32xf32, #tpu.memory_space<vmem>>, vector<2x32xf32>
    %c0_9 = arith.constant 0 : index
    %c0_10 = arith.constant 0 : index
    %4 = vector.load %arg6[%c0_9, %c0_10] : memref<2x1xf32, #tpu.memory_space<vmem>>, vector<2x1xf32>
    %c0_i32 = arith.constant 0 : i32
    %c1_i32 = arith.constant 1 : i32
    %5 = arith.muli %c0_i32, %c1_i32 : i32
    %c0_i32_11 = arith.constant 0 : i32
    %6 = arith.addi %c0_i32_11, %5 : i32
    %c256_i32 = arith.constant 256 : i32
    %7 = arith.muli %6, %c256_i32 : i32
    %8 = tpu.assume_multiple %7, 256 : i32
    %c0_12 = arith.constant 0 : index
    %9 = arith.index_cast %8 : i32 to index
    %10 = vector.load %arg1[%c0_12, %9] : memref<5x256xf32, #tpu.memory_space<vmem>>, vector<5x256xf32>
    %cst = arith.constant dense<0.000000e+00> : vector<96x256xf32>
    %11 = tpu.matmul %0, %10, %cst {dimension_numbers = #tpu.dot_dimension_numbers<[1], [0], [0], [1], [0, 0, 1, 1], [], []>} : vector<96x5xf32>, vector<5x256xf32>, vector<96x256xf32> -> vector<96x256xf32>
    %12 = vector.extract_strided_slice %11 {offsets = [0, 0], sizes = [32, 256], strides = [1, 1]} : vector<96x256xf32> to vector<32x256xf32>
    %13 = math.tanh %12 : vector<32x256xf32>
    %14 = vector.extract_strided_slice %11 {offsets = [32, 0], sizes = [32, 256], strides = [1, 1]} : vector<96x256xf32> to vector<32x256xf32>
    %15 = math.tanh %14 : vector<32x256xf32>
    %16 = vector.extract_strided_slice %11 {offsets = [64, 0], sizes = [32, 256], strides = [1, 1]} : vector<96x256xf32> to vector<32x256xf32>
    %17 = arith.subf %13, %15 : vector<32x256xf32>
    %18 = vector.extract_strided_slice %1 {offsets = [0, 0, 0], sizes = [1, 32, 32], strides = [1, 1, 1]} : vector<2x32x32xf32> to vector<1x32x32xf32>
    %19 = vector.shape_cast %18 : vector<1x32x32xf32> to vector<32x32xf32>
    %cst_13 = arith.constant dense<0.000000e+00> : vector<32x256xf32>
    %20 = tpu.matmul %19, %16, %cst_13 {dimension_numbers = #tpu.dot_dimension_numbers<[1], [0], [0], [1], [0, 0, 1, 1], [], []>} : vector<32x32xf32>, vector<32x256xf32>, vector<32x256xf32> -> vector<32x256xf32>
    %21 = vector.extract_strided_slice %2 {offsets = [0, 0, 0], sizes = [1, 32, 1], strides = [1, 1, 1]} : vector<2x32x1xf32> to vector<1x32x1xf32>
    %22 = vector.shape_cast %21 : vector<1x32x1xf32> to vector<32x1xf32>
    %23 = vector.broadcast %22 : vector<32x1xf32> to vector<32x256xf32>
    %24 = arith.addf %20, %23 : vector<32x256xf32>
    %25 = math.tanh %24 : vector<32x256xf32>
    %26 = arith.mulf %25, %17 : vector<32x256xf32>
    %27 = arith.addf %15, %26 : vector<32x256xf32>
    %28 = vector.extract_strided_slice %1 {offsets = [1, 0, 0], sizes = [1, 32, 32], strides = [1, 1, 1]} : vector<2x32x32xf32> to vector<1x32x32xf32>
    %29 = vector.shape_cast %28 : vector<1x32x32xf32> to vector<32x32xf32>
    %cst_14 = arith.constant dense<0.000000e+00> : vector<32x256xf32>
    %30 = tpu.matmul %29, %27, %cst_14 {dimension_numbers = #tpu.dot_dimension_numbers<[1], [0], [0], [1], [0, 0, 1, 1], [], []>} : vector<32x32xf32>, vector<32x256xf32>, vector<32x256xf32> -> vector<32x256xf32>
    %31 = vector.extract_strided_slice %2 {offsets = [1, 0, 0], sizes = [1, 32, 1], strides = [1, 1, 1]} : vector<2x32x1xf32> to vector<1x32x1xf32>
    %32 = vector.shape_cast %31 : vector<1x32x1xf32> to vector<32x1xf32>
    %33 = vector.broadcast %32 : vector<32x1xf32> to vector<32x256xf32>
    %34 = arith.addf %30, %33 : vector<32x256xf32>
    %35 = math.tanh %34 : vector<32x256xf32>
    %36 = arith.mulf %35, %17 : vector<32x256xf32>
    %37 = arith.addf %15, %36 : vector<32x256xf32>
    %cst_15 = arith.constant dense<0.000000e+00> : vector<2x256xf32>
    %38 = tpu.matmul %3, %37, %cst_15 {dimension_numbers = #tpu.dot_dimension_numbers<[1], [0], [0], [1], [0, 0, 1, 1], [], []>} : vector<2x32xf32>, vector<32x256xf32>, vector<2x256xf32> -> vector<2x256xf32>
    %39 = vector.broadcast %4 : vector<2x1xf32> to vector<2x256xf32>
    %40 = arith.addf %38, %39 : vector<2x256xf32>
    %c0_16 = arith.constant 0 : index
    %41 = arith.index_cast %8 : i32 to index
    %42 = vector.load %arg7[%c0_16, %41] : memref<2x256xf32, #tpu.memory_space<vmem>>, vector<2x256xf32>
    tpu.vector_store %arg7[%c0_16, %41], %40 {strides = array<i32>} : memref<2x256xf32, #tpu.memory_space<vmem>>, vector<2x256xf32>,
    %c1_i32_17 = arith.constant 1 : i32
    return
  }
  func.func @transform_0(%arg0: i32) -> (i32, i32) {
    %c0_i32 = arith.constant 0 : i32
    %c0_i32_0 = arith.constant 0 : i32
    return %c0_i32, %arg0 : i32, i32
  }
  func.func @transform_1(%arg0: i32) -> (i32, i32) {
    %c0_i32 = arith.constant 0 : i32
    %c0_i32_0 = arith.constant 0 : i32
    %c0_i32_1 = arith.constant 0 : i32
    return %c0_i32, %c0_i32_0 : i32, i32
  }
  func.func @transform_2(%arg0: i32) -> (i32, i32, i32) {
    %c0_i32 = arith.constant 0 : i32
    %c0_i32_0 = arith.constant 0 : i32
    %c0_i32_1 = arith.constant 0 : i32
    %c0_i32_2 = arith.constant 0 : i32
    return %c0_i32, %c0_i32_0, %c0_i32_1 : i32, i32, i32
  }
  func.func @transform_3(%arg0: i32) -> (i32, i32, i32) {
    %c0_i32 = arith.constant 0 : i32
    %c0_i32_0 = arith.constant 0 : i32
    %c0_i32_1 = arith.constant 0 : i32
    %c0_i32_2 = arith.constant 0 : i32
    return %c0_i32, %c0_i32_0, %c0_i32_1 : i32, i32, i32
  }
  func.func @transform_4(%arg0: i32) -> (i32, i32) {
    %c0_i32 = arith.constant 0 : i32
    %c0_i32_0 = arith.constant 0 : i32
    %c0_i32_1 = arith.constant 0 : i32
    return %c0_i32, %c0_i32_0 : i32, i32
  }
  func.func @transform_5(%arg0: i32) -> (i32, i32) {
    %c0_i32 = arith.constant 0 : i32
    %c0_i32_0 = arith.constant 0 : i32
    %c0_i32_1 = arith.constant 0 : i32
    return %c0_i32, %c0_i32_0 : i32, i32
  }
  func.func @transform_6(%arg0: i32) -> (i32, i32) {
    %c0_i32 = arith.constant 0 : i32
    %c0_i32_0 = arith.constant 0 : i32
    return %c0_i32, %arg0 : i32, i32
  }
}

</mosaic_0001>

<bundles_post_ra>
// kernel: tpu_custom_call.1
= control target key start
LH: loop header
LB: loop body
LE: loop exit
PB: predicated region body
PF: predicated region fallthrough
CT: control target
= control target key end

     0   :  { %11 = vsyncpa [#allocation3], 0  ;;  %s1480_s0 = inlined_call_operand.vmem [shape: f32[5,512], index: 0, kind: input, shape index: {}]   ;;  %s1481_s1 = inlined_call_operand.vmem [shape: f32[96,5], index: 1, kind: input, shape index: {}]   ;;  %s1482_s2 = inlined_call_operand.vmem [shape: f32[2,32,32], index: 2, kind: input, shape index: {}]   ;;  %s1483_s3 = inlined_call_operand.vmem [shape: f32[2,32,1], index: 3, kind: input, shape index: {}]   ;;  %s1484_s4 = inlined_call_operand.vmem [shape: f32[2,32], index: 4, kind: input, shape index: {}]   ;;  %s1485_s5 = inlined_call_operand.vmem [shape: f32[2,1], index: 5, kind: input, shape index: {}]   ;;  %s1486_s6 = inlined_call_operand.hbm [shape: f32[2,512], index: 6, kind: output, shape index: {}]  }
   0x1   :  { %13 = vsyncpa [#allocation3 + $0x1], 0  ;;  %s1190_s21 = smov 0   ;;  %s1192_s22 = smov 0  }
   0x2   :  { %s1194_s23 = smov 0   ;;  %s1196_s24 = smov 0  }
   0x3 LB: > { %s1211_s25 = sadd.s32 4294967295, %s1150_s24   ;;  %s946_s26 = sadd.s32 4294967294, %s1150_s24   ;;  %s1150_s24 = sphi %s1196_s24, %s1492_s24   ;;  %s1146_s23 = sphi %s1194_s23, %s1491_s23   ;;  %s1142_s22 = sphi %s1192_s22, %s1490_s22   ;;  %s1138_s21 = sphi %s1190_s21, %s1489_s21  }
   0x4   : > { %s1215_s27 = sadd.s32 1, %s1150_s24   ;;  %s157_s28 = sadd.s32 1, %s1146_s23 }
   0x5   : > { %s154_s29 = ssub.s32 %s1150_s24, %s1215_s27  ;;  %p167_p0 = scmp.ne.s32.totalorder %s1146_s23, %s1142_s22 }
   0x6   : > { %p155_p1 = scmp.eq.s32.totalorder %s154_s29, 0  ;;  %p168_p2 = scmp.eq.s32.totalorder %s1211_s25, 1 }
   0x7   : > { %p173_p3 = scmp.ne.s32.totalorder %s1142_s22, %s1138_s21  ;;  %p174_p4 = scmp.eq.s32.totalorder %s946_s26, 1 }
   0x8   : > { %s1226_s30 = scalar_select %p155_p1, %s1146_s23, %s157_s28  }
   0x9   : > { %p1228_p5 = por %p168_p2, %p167_p0  ;;  %p1232_p6 = por %p174_p4, %p173_p3 }
   0xa   : > { %p949_p7 = scmp.ge.s32.totalorder %s1150_s24, 1  ;;  %p216_p8 = scmp.lt.s32.totalorder %s1150_s24, 3 }
   0xc   : > { %p217_p9 = pnand %p949_p7, %p216_p8 }
   0xd   : > { %s951_s9 = sshll.u32 (!%p217_p9), %s1211_s25, 1  ;;  %s243_s14 = sand.u32 (!%p217_p9), 1, %s1142_s22  }
   0xe   : > { %220 = sbr.rel (%p217_p9) target bundleno = 954 (0x3ba), region = 44  ;;  %p247_p10 = scmp.lt.s32.totalorder (!%p217_p9), %s951_s9, 3 }
   0xf   : > { %s950_s15 = sshll.u32 (!%p217_p9), %s243_s14, 2  ;;  %s982_s16 = sshll.u32 (!%p217_p9), %s1211_s25, 6 }
  0x10   : > { %s245_s17 = scalar_lea.vmem (!%p217_p9), [#allocation2], %s950_s15  ;;  %s885_s26 = scalar_lea.hbm (!%p217_p9), %s1486_s6, %s982_s16 }
  0x11   : > { %s887_s18 = sshll.u32 (!%p217_p9), %s245_s17, 4  ;;  %s873_s28 = scalar_lea.sflag (!%p217_p9), [#allocation3], %s243_s14  ;;  %s888_s18 = int_to_ptr.vmem [resolvable:$true] %s887_s18 }
  0x12   : > { %s1090_s29 = scalar_lea.vmem (!%p217_p9), %s888_s18, 64 }
  0x13   : > { %v1152_v0 = vmov 0.0   ;;  %s1494_s9 = smov (!%p247_p10, %s951_s9), 3  ;;  %vm322_vm0 = vcmask 1044480   ;;  %v253_v3 = vld [vmem:[%s1481_s1] sm:$0xff]  ;;  %vm285_vm1 = vcmask 39936   ;;  %v254_v4 = vld [vmem:[%s1481_s1 + $0x8] sm:$0xff]  ;;  %p1091_p11 = scmp.ne.s32.totalorder %s888_s18, %s1090_s29 }
  0x14   : > { %393 = vmatprep.mubr.f32.mxu0 %v1152_v0  ;;  %587 = vmatprep.mubr.f32.mxu1 %v1152_v0  ;;  %s952_s10 = sshll.u32 %s1494_s9, 3  ;;  %v255_v5 = vld [vmem:[%s1481_s1 + $0x10] sm:$0xff]  ;;  %v256_v6 = vld [vmem:[%s1481_s1 + $0x18] sm:$0xff]  ;;  %v257_v7 = vld [vmem:[%s1481_s1 + $0x20] sm:$0xff]  ;;  %v1153_v17 = vmov 0   ;;  %vm510_vm2 = vcmask 261120  }
  0x15   : > { %s250_s13 = scalar_lea.vmem %s1480_s0, %s952_s10  ;;  %v258_v8 = vld [vmem:[%s1481_s1 + $0x28] sm:$0xff]  ;;  %v259_v9 = vld [vmem:[%s1481_s1 + $0x30] sm:$0xff]  ;;  %v260_v10 = vld [vmem:[%s1481_s1 + $0x38] sm:$0xff]  ;;  %1025 = vset.pattern.permute.xlu1 %v1153_v17  ;;  %1024 = vset.pattern.permute.xlu0 %v1153_v17  ;;  %p1092_p12 = pnand %p1091_p11, %p1228_p5 }
  0x16   : > { %v284_v1 = vld [vmem:[%s250_s13 + $0x8] sm:$0x1f]  ;;  %v283_v2 = vld [vmem:[%s250_s13] sm:$0x1f]  ;;  %v263_v13 = vld [vmem:[%s1481_s1 + $0x50] sm:$0xff]  ;;  %s1154_s9 = smov [#allocation2]  }
  0x17   : > { %953 = vmatprep.subr.msk.mxu0 %vm322_vm0, %v284_v1  ;;  %v261_v11 = vld [vmem:[%s1481_s1 + $0x40] sm:$0xff]  ;;  %v262_v12 = vld [vmem:[%s1481_s1 + $0x48] sm:$0xff]  ;;  %v264_v14 = vld [vmem:[%s1481_s1 + $0x58] sm:$0xff]  ;;  %p1093_p13 = pneg %p1092_p12  ;;  %s1094_s10 = sshll.u32 %s1154_s9, 4  ;;  %s1095_s10 = int_to_ptr.vmem [resolvable:$false] %s1094_s10 }
  0x18   : > { %954 = vmatpush1.msk.msra.mxu0 %vm322_vm0, %v283_v2  ;;  %v276_v15 = vld [vmem:[%s1483_s3 + $0x18] sm:$0xff]  ;;  %v274_v16 = vld [vmem:[%s1483_s3 + $0x8] sm:$0xff]  ;;  %v275_v18 = vld [vmem:[%s1483_s3 + $0x10] sm:$0xff]  ;;  %s1096_s25 = scalar_lea.vmem %s1095_s10, 128  ;;  %p1097_p0 = scmp.lt.s32.totalorder %s888_s18, %s1095_s10 }
  0x19   : > { %955 = vmatmul.mubr.msk.f32.vlgmr.msra.gmra.mxu0 %vm285_vm1, %v253_v3  ;;  %507 = vperm.xlu0 %1024, %v276_v15   ;;  %v273_v19 = vld [vmem:[%s1483_s3] sm:$0xff]  ;;  %v280_v20 = vld [vmem:[%s1483_s3 + $0x38] sm:$0xff]  ;;  %v279_v21 = vld [vmem:[%s1483_s3 + $0x30] sm:$0xff]  ;;  %p1098_p1 = scmp.lt.s32.totalorder %s1096_s25, %s1090_s29 }
  0x1a   : > { %399 = vmatprep.mubr.f32.mxu0 %v1152_v0  ;;  %497 = vperm.xlu1 %1025, %v274_v16   ;;  %v278_v22 = vld [vmem:[%s1483_s3 + $0x28] sm:$0xff]  ;;  %v277_v23 = vld [vmem:[%s1483_s3 + $0x20] sm:$0xff]  ;;  %v267_v51 = vld [vmem:[%s1482_s2 + $0x10] sm:$0xff] }
  0x1b   : > { %v282_v24 = vld [vmem:[%s1485_s5] sm:$0x3]  ;;  %v266_v50 = vld [vmem:[%s1482_s2 + $0x8] sm:$0xff]  ;;  %v268_v52 = vld [vmem:[%s1482_s2 + $0x18] sm:$0xff]  ;;  %p1099_p2 = por %p1098_p1, %p1097_p0 }
  0x1c   : > { %v265_v49 = vld [vmem:[%s1482_s2] sm:$0xff] }
  0x1d   : > { %956 = vmatmul.mubr.msk.f32.gmra.mxu0 %vm285_vm1, %v254_v4  ;;  %502 = vperm.xlu0 %1024, %v275_v18   ;;  %p1100_p3 = pnand %p1099_p2, %p1093_p13 }
  0x1e   : > { %405 = vmatprep.mubr.f32.mxu0 %v1152_v0  ;;  %492 = vperm.xlu1 %1025, %v273_v19  }
  0x21   : > { %957 = vmatmul.mubr.msk.f32.gmra.mxu0 %vm285_vm1, %v255_v5  ;;  %653 = vperm.xlu0 %1024, %v280_v20  }
  0x22   : > { %411 = vmatprep.mubr.f32.mxu0 %v1152_v0  ;;  %648 = vperm.xlu1 %1025, %v279_v21  }
  0x25   : > { %958 = vmatmul.mubr.msk.f32.gmra.mxu0 %vm285_vm1, %v256_v6  ;;  %643 = vperm.xlu0 %1024, %v278_v22  }
  0x26   : > { %417 = vmatprep.mubr.f32.mxu0 %v1152_v0  ;;  %638 = vperm.xlu1 %1025, %v277_v23  }
  0x29   : > { %959 = vmatmul.mubr.msk.f32.gmra.mxu0 %vm285_vm1, %v257_v7  ;;  %783 = vperm.xlu0 %1024, %v282_v24  }
  0x2a   : > { %423 = vmatprep.mubr.f32.mxu0 %v1152_v0 }
  0x2d   : > { %960 = vmatmul.mubr.msk.f32.gmra.mxu0 %vm285_vm1, %v258_v8 }
  0x2e   : > { %429 = vmatprep.mubr.f32.mxu0 %v1152_v0 }
  0x31   : > { %961 = vmatmul.mubr.msk.f32.gmra.mxu0 %vm285_vm1, %v259_v9 }
  0x32   : > { %435 = vmatprep.mubr.f32.mxu0 %v1152_v0 }
  0x35   : > { %962 = vmatmul.mubr.msk.f32.gmra.mxu0 %vm285_vm1, %v260_v10 }
  0x36   : > { %441 = vmatprep.mubr.f32.mxu0 %v1152_v0 }
  0x39   : > { %963 = vmatmul.mubr.msk.f32.gmra.mxu0 %vm285_vm1, %v261_v11 }
  0x3a   : > { %447 = vmatprep.mubr.f32.mxu0 %v1152_v0 }
  0x3d   : > { %964 = vmatmul.mubr.msk.f32.gmra.mxu0 %vm285_vm1, %v262_v12 }
  0x3e   : > { %453 = vmatprep.mubr.f32.mxu0 %v1152_v0 }
  0x41   : > { %965 = vmatmul.mubr.msk.f32.gmra.mxu0 %vm285_vm1, %v263_v13 }
  0x42   : > { %459 = vmatprep.mubr.f32.mxu0 %v1152_v0 }
  0x45   : > { %966 = vmatmul.mubr.msk.f32.gmra.mxu0 %vm285_vm1, %v264_v14 }
  0x94   : > { %v508_v55 = vpop.permute.xlu0 %507 }
  0x95   : > { %v498_v58 = vpop.permute.xlu1 %497 }
  0x98   : > { %v503_v62 = vpop.permute.xlu0 %502 }
  0x99   : > { %v493_v7 = vpop.permute.xlu1 %492 }
  0xd9   : > { %v395_v25 = vpop.f32.mrf.mxu0 }
  0xda   : > { %1026 = vtanh.f32 %v395_v25 }
  0xdb   : > { %v397_v26 = vpop.f32.mrf.mxu0 }
  0xdc   : > { %1028 = vtanh.f32 %v397_v26 }
  0xdd   : > { %v401_v27 = vpop.f32.mrf.mxu0 }
  0xde   : > { %1030 = vtanh.f32 %v401_v27 }
  0xdf   : > { %v403_v28 = vpop.f32.mrf.mxu0 }
  0xe0   : > { %1032 = vtanh.f32 %v403_v28 }
  0xe1   : > { %v407_v29 = vpop.f32.mrf.mxu0 }
  0xe2   : > { %1034 = vtanh.f32 %v407_v29 }
  0xe3   : > { %v409_v30 = vpop.f32.mrf.mxu0 }
  0xe4   : > { %1036 = vtanh.f32 %v409_v30 }
  0xe5   : > { %v413_v31 = vpop.f32.mrf.mxu0 }
  0xe6   : > { %1038 = vtanh.f32 %v413_v31 }
  0xe7   : > { %v415_v32 = vpop.f32.mrf.mxu0  ;;  %v1027_v61 = vpop.eup %1026 }
  0xe8   : > { %1040 = vtanh.f32 %v415_v32 }
  0xe9   : > { %v419_v33 = vpop.f32.mrf.mxu0  ;;  %v1029_v1 = vpop.eup %1028 }
  0xea   : > { %1042 = vtanh.f32 %v419_v33 }
  0xeb   : > { %v421_v34 = vpop.f32.mrf.mxu0  ;;  %v1031_v3 = vpop.eup %1030 }
  0xec   : > { %1044 = vtanh.f32 %v421_v34 }
  0xed   : > { %v425_v35 = vpop.f32.mrf.mxu0  ;;  %v1033_v6 = vpop.eup %1032 }
  0xee   : > { %1046 = vtanh.f32 %v425_v35 }
  0xef   : > { %v427_v36 = vpop.f32.mrf.mxu0  ;;  %v1035_v9 = vpop.eup %1034 }
  0xf0   : > { %1048 = vtanh.f32 %v427_v36 }
  0xf1   : > { %v431_v37 = vpop.f32.mrf.mxu0  ;;  %v1037_v12 = vpop.eup %1036 }
  0xf2   : > { %1050 = vtanh.f32 %v431_v37 }
  0xf3   : > { %v433_v38 = vpop.f32.mrf.mxu0  ;;  %v1039_v15 = vpop.eup %1038 }
  0xf4   : > { %1052 = vtanh.f32 %v433_v38 }
  0xf5   : > { %v437_v39 = vpop.f32.mrf.mxu0  ;;  %v1041_v17 = vpop.eup %1040 }
  0xf6   : > { %1054 = vtanh.f32 %v437_v39 }
  0xf7   : > { %v439_v40 = vpop.f32.mrf.mxu0  ;;  %v1350_v18 = vpop.eup %1042 }
  0xf8   : > { %1056 = vtanh.f32 %v439_v40 }
  0xf9   : > { %v443_v41 = vpop.f32.mrf.mxu0  ;;  %v1352_v19 = vpop.eup %1044 }
  0xfb   : > { %v445_v42 = vpop.f32.mrf.mxu0  ;;  %v1354_v20 = vpop.eup %1046 }
  0xfd   : > { %v449_v43 = vpop.f32.mrf.mxu0  ;;  %v1356_v21 = vpop.eup %1048 }
  0xfe   : > { %v1382_v39 = vsub.f32 %v1033_v6, %v1356_v21 }
  0xff   : > { %v451_v44 = vpop.f32.mrf.mxu0  ;;  %v1358_v22 = vpop.eup %1050 }
 0x100   : > { %v1377_v35 = vsub.f32 %v1035_v9, %v1358_v22 }
 0x101   : > { %v455_v45 = vpop.f32.mrf.mxu0  ;;  %v1360_v23 = vpop.eup %1052 }
 0x102   : > { %v1373_v32 = vsub.f32 %v1037_v12, %v1360_v23 }
 0x103   : > { %v457_v46 = vpop.f32.mrf.mxu0  ;;  %v1362_v24 = vpop.eup %1054 }
 0x104   : > { %v1367_v29 = vsub.f32 %v1039_v15, %v1362_v24 }
 0x105   : > { %v461_v47 = vpop.f32.mrf.mxu0  ;;  %v1364_v25 = vpop.eup %1056 }
 0x106   : > { %v1370_v31 = vsub.f32 %v1041_v17, %v1364_v25 }
 0x107   : > { %v463_v48 = vpop.f32.mrf.mxu0 }
 0x108   : > { %547 = vmatprep.subr.mxu1 %v463_v48 }
 0x109   : > { %548 = vmatpush1.msra.mxu1 %v461_v47 }
 0x10a   : > { %549 = vmatprep.subr.mxu1 %v457_v46  ;;  %v1391_v46 = vsub.f32 %v1029_v1, %v1352_v19 }
 0x10b   : > { %550 = vmatpush1.msra.mxu1 %v455_v45 }
 0x10c   : > { %551 = vmatprep.subr.mxu1 %v451_v44 }
 0x10d   : > { %552 = vmatpush1.msra.mxu1 %v449_v43 }
 0x10e   : > { %553 = vmatprep.subr.mxu1 %v445_v42  ;;  %v1386_v42 = vsub.f32 %v1031_v3, %v1354_v20 }
 0x10f   : > { %554 = vmatpush1.msra.mxu1 %v443_v41 }
 0x110   : > { %967 = vmatmul.mubr.msk.f32.vlgmr.msra.gmra.mxu1 %vm510_vm2, %v265_v49  ;;  %v1396_v49 = vsub.f32 %v1027_v61, %v1350_v18  ;;  %v272_v61 = vld [vmem:[%s1482_s2 + $0x38] sm:$0xff] }
 0x111   : > { %593 = vmatprep.mubr.f32.mxu1 %v1152_v0 }
 0x114   : > { %968 = vmatmul.mubr.msk.f32.gmra.mxu1 %vm510_vm2, %v266_v50 }
 0x115   : > { %599 = vmatprep.mubr.f32.mxu1 %v1152_v0 }
 0x118   : > { %969 = vmatmul.mubr.msk.f32.gmra.mxu1 %vm510_vm2, %v267_v51 }
 0x119   : > { %605 = vmatprep.mubr.f32.mxu1 %v1152_v0 }
 0x11c   : > { %970 = vmatmul.mubr.msk.f32.gmra.mxu1 %vm510_vm2, %v268_v52 }
 0x11d   : > { %732 = vmatprep.mubr.f32.mxu1 %v1152_v0 }
 0x1d0   : > { %v589_v53 = vpop.f32.mrf.mxu1 }
 0x1d1   : > { %v590_v16 = vadd.f32 %v589_v53, %v493_v7 }
 0x1d2   : > { %v591_v54 = vpop.f32.mrf.mxu1 }
 0x1d3   : > { %v592_v13 = vadd.f32 %v591_v54, %v493_v7 }
 0x1d4   : > { %v595_v56 = vpop.f32.mrf.mxu1 }
 0x1d5   : > { %v596_v10 = vadd.f32 %v595_v56, %v498_v58 }
 0x1d6   : > { %v597_v57 = vpop.f32.mrf.mxu1 }
 0x1d7   : > { %v598_v60 = vadd.f32 %v597_v57, %v498_v58  ;;  %v269_v58 = vld [vmem:[%s1482_s2 + $0x20] sm:$0xff] }
 0x1d8   : > { %v601_v59 = vpop.f32.mrf.mxu1 }
 0x1d9   : > { %v602_v4 = vadd.f32 %v601_v59, %v503_v62  ;;  %1058 = vtanh.f32 %v598_v60  ;;  %v270_v59 = vld [vmem:[%s1482_s2 + $0x28] sm:$0xff]  ;;  %v271_v60 = vld [vmem:[%s1482_s2 + $0x30] sm:$0xff] }
 0x1da   : > { %v603_v63 = vpop.f32.mrf.mxu1 }
 0x1db   : > { %v604_v2 = vadd.f32 %v603_v63, %v503_v62  ;;  %v654_v63 = vpop.permute.xlu0 %653 }
 0x1dc   : > { %v607_v5 = vpop.f32.mrf.mxu1 }
 0x1dd   : > { %v608_v8 = vadd.f32 %v607_v5, %v508_v55  ;;  %1060 = vtanh.f32 %v604_v2  ;;  %v649_v5 = vpop.permute.xlu1 %648 }
 0x1de   : > { %v609_v11 = vpop.f32.mrf.mxu1 }
 0x1df   : > { %1062 = vtanh.f32 %v608_v8  ;;  %v610_v14 = vadd.f32 %v609_v11, %v508_v55 }
 0x1e0   : > { %1064 = vtanh.f32 %v602_v4  ;;  %v644_v4 = vpop.permute.xlu0 %643 }
 0x1e1   : > { %1066 = vtanh.f32 %v610_v14 }
 0x1e2   : > { %1068 = vtanh.f32 %v596_v10 }
 0x1e3   : > { %1070 = vtanh.f32 %v592_v13  ;;  %v639_v13 = vpop.permute.xlu1 %638 }
 0x1e4   : > { %1072 = vtanh.f32 %v590_v16 }
 0x1e6   : > { %v1059_v26 = vpop.eup %1058 }
 0x1e7   : > { %v623_v45 = vmul.f32 %v1059_v26, %v1382_v39 }
 0x1e9   : > { %v631_v54 = vadd.f32 %v1356_v21, %v623_v45 }
 0x1ea   : > { %v1061_v27 = vpop.eup %1060 }
 0x1eb   : > { %v625_v38 = vmul.f32 %v1061_v27, %v1373_v32 }
 0x1ec   : > { %v1063_v28 = vpop.eup %1062 }
 0x1ed   : > { %v1065_v30 = vpop.eup %1064  ;;  %v626_v34 = vmul.f32 %v1063_v28, %v1367_v29  ;;  %v633_v50 = vadd.f32 %v1360_v23, %v625_v38 }
 0x1ee   : > { %v1067_v33 = vpop.eup %1066  ;;  %v624_v41 = vmul.f32 %v1065_v30, %v1377_v35 }
 0x1ef   : > { %v1069_v36 = vpop.eup %1068  ;;  %v627_v37 = vmul.f32 %v1067_v33, %v1370_v31  ;;  %v634_v47 = vadd.f32 %v1362_v24, %v626_v34 }
 0x1f0   : > { %v1071_v40 = vpop.eup %1070  ;;  %v622_v48 = vmul.f32 %v1069_v36, %v1386_v42  ;;  %v632_v52 = vadd.f32 %v1358_v22, %v624_v41 }
 0x1f1   : > { %v1073_v43 = vpop.eup %1072  ;;  %v635_v44 = vadd.f32 %v1364_v25, %v627_v37  ;;  %v621_v51 = vmul.f32 %v1071_v40, %v1391_v46 }
 0x1f2   : > { %v620_v53 = vmul.f32 %v1073_v43, %v1396_v49  ;;  %v630_v55 = vadd.f32 %v1354_v20, %v622_v48 }
 0x1f3   : > { %692 = vmatprep.subr.mxu1 %v635_v44  ;;  %v629_v56 = vadd.f32 %v1352_v19, %v621_v51 }
 0x1f4   : > { %693 = vmatpush1.msra.mxu1 %v634_v47  ;;  %v628_v57 = vadd.f32 %v1350_v18, %v620_v53 }
 0x1f5   : > { %694 = vmatprep.subr.mxu1 %v633_v50 }
 0x1f6   : > { %695 = vmatpush1.msra.mxu1 %v632_v52 }
 0x1f7   : > { %696 = vmatprep.subr.mxu1 %v631_v54 }
 0x1f8   : > { %697 = vmatpush1.msra.mxu1 %v630_v55 }
 0x1f9   : > { %698 = vmatprep.subr.mxu1 %v629_v56 }
 0x1fa   : > { %699 = vmatpush1.msra.mxu1 %v628_v57 }
 0x1fb   : > { %971 = vmatmul.mubr.msk.f32.vlgmr.msra.gmra.mxu1 %vm510_vm2, %v269_v58 }
 0x1fc   : > { %738 = vmatprep.mubr.f32.mxu1 %v1152_v0 }
 0x1ff   : > { %972 = vmatmul.mubr.msk.f32.gmra.mxu1 %vm510_vm2, %v270_v59 }
 0x200   : > { %744 = vmatprep.mubr.f32.mxu1 %v1152_v0 }
 0x203   : > { %973 = vmatmul.mubr.msk.f32.gmra.mxu1 %vm510_vm2, %v271_v60 }
 0x204   : > { %750 = vmatprep.mubr.f32.mxu1 %v1152_v0 }
 0x207   : > { %974 = vmatmul.mubr.msk.f32.gmra.mxu1 %vm510_vm2, %v272_v61 }
 0x208   : > { %853 = vmatprep.mubr.f32.mxu1 %v1152_v0 }
 0x2bb   : > { %v734_v62 = vpop.f32.mrf.mxu1 }
 0x2bc   : > { %v735_v17 = vadd.f32 %v734_v62, %v639_v13 }
 0x2bd   : > { %v736_v1 = vpop.f32.mrf.mxu1 }
 0x2be   : > { %v737_v0 = vadd.f32 %v736_v1, %v639_v13 }
 0x2bf   : > { %v740_v2 = vpop.f32.mrf.mxu1 }
 0x2c0   : > { %v741_v14 = vadd.f32 %v740_v2, %v644_v4 }
 0x2c1   : > { %v742_v3 = vpop.f32.mrf.mxu1 }
 0x2c2   : > { %v743_v7 = vadd.f32 %v742_v3, %v644_v4 }
 0x2c3   : > { %v746_v6 = vpop.f32.mrf.mxu1 }
 0x2c4   : > { %v747_v10 = vadd.f32 %v746_v6, %v649_v5  ;;  %1074 = vtanh.f32 %v743_v7 }
 0x2c5   : > { %v748_v8 = vpop.f32.mrf.mxu1 }
 0x2c6   : > { %v749_v9 = vadd.f32 %v748_v8, %v649_v5 }
 0x2c7   : > { %v752_v11 = vpop.f32.mrf.mxu1 }
 0x2c8   : > { %v753_v12 = vadd.f32 %v752_v11, %v654_v63  ;;  %1076 = vtanh.f32 %v749_v9 }
 0x2c9   : > { %v754_v15 = vpop.f32.mrf.mxu1 }
 0x2ca   : > { %1078 = vtanh.f32 %v753_v12  ;;  %v755_v16 = vadd.f32 %v754_v15, %v654_v63 }
 0x2cb   : > { %1080 = vtanh.f32 %v747_v10 }
 0x2cc   : > { %1082 = vtanh.f32 %v755_v16 }
 0x2cd   : > { %1084 = vtanh.f32 %v741_v14 }
 0x2ce   : > { %1086 = vtanh.f32 %v737_v0 }
 0x2cf   : > { %1088 = vtanh.f32 %v735_v17 }
 0x2d1   : > { %v1075_v26 = vpop.eup %1074 }
 0x2d2   : > { %v768_v45 = vmul.f32 %v1075_v26, %v1382_v39  ;;  %v281_v39 = vld [vmem:[%s1484_s4] sm:$0x3] }
 0x2d5   : > { %v1077_v27 = vpop.eup %1076 }
 0x2d6   : > { %v770_v38 = vmul.f32 %v1077_v27, %v1373_v32 }
 0x2d7   : > { %v1079_v28 = vpop.eup %1078 }
 0x2d8   : > { %v1081_v30 = vpop.eup %1080  ;;  %v771_v34 = vmul.f32 %v1079_v28, %v1367_v29  ;;  %v778_v29 = vadd.f32 %v1360_v23, %v770_v38 }
 0x2d9   : > { %v1083_v33 = vpop.eup %1082  ;;  %v769_v41 = vmul.f32 %v1081_v30, %v1377_v35 }
 0x2da   : > { %v1085_v36 = vpop.eup %1084  ;;  %v772_v37 = vmul.f32 %v1083_v33, %v1370_v31  ;;  %v779_v47 = vadd.f32 %v1362_v24, %v771_v34 }
 0x2db   : > { %v1087_v40 = vpop.eup %1086  ;;  %v767_v48 = vmul.f32 %v1085_v36, %v1386_v42  ;;  %v777_v31 = vadd.f32 %v1358_v22, %v769_v41  ;;  %v784_v22 = vpop.permute.xlu0 %783 }
 0x2dc   : > { %v1089_v43 = vpop.eup %1088  ;;  %v780_v44 = vadd.f32 %v1364_v25, %v772_v37  ;;  %v766_v50 = vmul.f32 %v1087_v40, %v1391_v46  ;;  %v776_v25 = vadd.f32 %v1356_v21, %v768_v45 }
 0x2dd   : > { %v765_v32 = vmul.f32 %v1089_v43, %v1396_v49  ;;  %v775_v24 = vadd.f32 %v1354_v20, %v767_v48 }
 0x2de   : > { %813 = vmatprep.subr.mxu1 %v780_v44  ;;  %v774_v35 = vadd.f32 %v1352_v19, %v766_v50 }
 0x2df   : > { %814 = vmatpush1.msra.mxu1 %v779_v47  ;;  %v773_v23 = vadd.f32 %v1350_v18, %v765_v32 }
 0x2e0   : > { %815 = vmatprep.subr.mxu1 %v778_v29 }
 0x2e1   : > { %816 = vmatpush1.msra.mxu1 %v777_v31 }
 0x2e2   : > { %817 = vmatprep.subr.mxu1 %v776_v25 }
 0x2e3   : > { %818 = vmatpush1.msra.mxu1 %v775_v24 }
 0x2e4   : > { %819 = vmatprep.subr.mxu1 %v774_v35 }
 0x2e5   : > { %820 = vmatpush1.msra.mxu1 %v773_v23 }
 0x2e6   : > { %975 = vmatmul.mubr.msk.f32.vlgmr.msra.gmra.mxu1 %vm510_vm2, %v281_v39 }
 0x3a6   : > { %v855_v21 = vpop.f32.mrf.mxu1 }
 0x3a7   : > { %v856_v19 = vadd.f32 %v855_v21, %v784_v22 }
 0x3a8   : > { %v857_v20 = vpop.f32.mrf.mxu1 }
 0x3a9   : > { %v858_v42 = vadd.f32 %v857_v20, %v784_v22 }
 0x3ab   : > { %v862_v18 = vcombine.low %v856_v19, %v858_v42 }
 0x3ad   : > { %976 = vst.sshfl [vmem:[%s245_s17] sm:$0x33 pattern:$0x76325410] %v862_v18 }
 0x3ae   : > { %1103 = shalt.err (!%p1100_p3)
}
 0x3af   : > { %s1104_s11 = scalar_lea.hbm %s885_s26, 64  ;;  %s1108_s14 = scalar_lea.hbm %s1486_s6, 128 }
 0x3b0   : > { %p1105_p4 = scmp.ne.s32.totalorder %s885_s26, %s1104_s11  ;;  %p1109_p9 = scmp.lt.s32.totalorder %s885_s26, %s1486_s6 }
 0x3b1   : > { %p1110_p10 = scmp.lt.s32.totalorder %s1108_s14, %s1104_s11 }
 0x3b2   : > { %p1106_p7 = pnand %p1105_p4, %p1228_p5 }
 0x3b3   : > { %p1111_p11 = por %p1110_p10, %p1109_p9 }
 0x3b4   : > { %p1107_p8 = pneg %p1106_p7 }
 0x3b6   : > { %p1112_p12 = pnand %p1111_p11, %p1107_p8 }
 0x3b8   : > { %1115 = shalt.err (!%p1112_p12)
}
 0x3b9   : > { %983 = dma.vmem_to_hbm [thread:$0]  (%p1228_p5), %s888_s18, 64, %s885_s26, %s873_s28  }
 0x3ba PF: > { %p989_p13 = scmp.ge.s32.totalorder %s1150_s24, 2  ;;  %s899_s17 = sand.u32 1, %s1138_s21  }
 0x3bb   : > { %s900_s19 = scalar_lea.sflag [#allocation3], %s899_s17 }
 0x3bc   : > { %p986_p0 = pnand %p989_p13, %p1232_p6 }
 0x3be   : > { %p987_p1 = pneg %p986_p0 }
 0x3c0   : > { %1133 = dma.done.wait (%p987_p1), %s900_s19, 64  }
 0x3c1   : > { %1135 = vsyncadd (%p987_p1), %s900_s19, 4294967232  ;;  %p16_p2 = scmp.ge.s32.totalorder %s1215_s27, 4   ;;  %s1489_s21 = smov %s1142_s22 }
 0x3c2   : > { %s1490_s22 = smov %s1146_s23  ;;  %s1491_s23 = smov %s1226_s30 }
 0x3c3   : > { %s1492_s24 = smov %s1215_s27  ;;  %18 = sbr.rel (!%p16_p2) target bundleno = 3 (0x3), region = 79 }
 0x3c8   :  { %905 = vsyncpa [#allocation3], 1 }
 0x3c9   :  { %907 = vsyncpa [#allocation3 + $0x1], 1 }

</bundles_post_ra>
